<compile_context>
chip_gen: v6e
topology: v6e:2x2x1
jax: 0.10.0
libtpu: 0.0.40
codegen_flags: <defaults>
</compile_context>

<pallas_src>
import math

import jax
import jax.numpy as jnp
from jax import lax
from jax.experimental import pallas as pl
from jax.experimental.pallas import tpu as pltpu


# ----------------------------- Pallas kernel ------------------------------ #

def _make_sobel_kernel(H):
    """Kernel over a (Bt*H, W) slab holding Bt stacked single-channel images."""

    def kernel(x_ref, o_ref):
        R, W = x_ref.shape                       # R = Bt * H
        x = x_ref[...].astype(jnp.float32)

        # Per-element row (image-local) / column indices for boundary masks.
        row = lax.broadcasted_iota(jnp.int32, (R, W), 0) % H
        col = lax.broadcasted_iota(jnp.int32, (R, W), 1)
        first_row = row == 0
        last_row = row == H - 1
        first_col = col == 0
        last_col = col == W - 1

        # Lane-axis (W) neighbours with zero padding (XLU rolls + VPU selects).
        xl = jnp.where(first_col, 0.0, pltpu.roll(x, shift=1, axis=1))      # x[.., j-1]
        xr = jnp.where(last_col, 0.0, pltpu.roll(x, shift=W - 1, axis=1))   # x[.., j+1]

        # Separable row passes (cross-correlation, matching nn.Conv2d).
        dx = xr - xl                              # [-1, 0, 1]
        sy = xl + 2.0 * x + xr                    # [ 1, 2, 1]

        # Sublane-axis (H) neighbours with zero padding.  Wrap across image
        # boundaries inside the slab is zeroed by the first/last-row masks.
        dxu = jnp.where(first_row, 0.0, pltpu.roll(dx, shift=1, axis=0))     # dx[i-1]
        dxd = jnp.where(last_row, 0.0, pltpu.roll(dx, shift=R - 1, axis=0))  # dx[i+1]
        syu = jnp.where(first_row, 0.0, pltpu.roll(sy, shift=1, axis=0))     # sy[i-1]
        syd = jnp.where(last_row, 0.0, pltpu.roll(sy, shift=R - 1, axis=0))  # sy[i+1]

        gx = dxu + 2.0 * dx + dxd                 # Kx = [1,2,1]^T (x) [-1,0,1]
        gy = syd - syu                            # Ky = [-1,0,1]^T (x) [1,2,1]

        o_ref[...] = jnp.sqrt(gx * gx + gy * gy).astype(o_ref.dtype)

    return kernel


# ------------------------------- wrapper ----------------------------------- #

def sobel_edge_detection(x, *, block_images=None):
    """PyTorch-compatible forward.  x: (N, 1, H, W) float32 -> (N, 1, H, W)."""
    N, C, H, W = x.shape
    assert C == 1, "SobelEdgeDetection operates on single-channel input"

    # Images per grid step.  Bt*H must be sublane (8) aligned.
    mult = 8 // math.gcd(H, 8)
    if block_images is None:
        # ~10 live f32 (H, W) slabs per image per step (incl. double buffers);
        # keep one step's working set well under v7x scoped VMEM.
        budget_imgs = max(1, (24 << 20) // (10 * H * W * 4))
        block_images = min(8, budget_imgs, N)
        # Keep >= 2 parallel grid steps when the batch allows (v7x has 2 TCs).
        if N >= 2 * mult:
            block_images = min(block_images, max(mult, N // 2))
    bt = max(mult, (block_images // mult) * mult)

    n_pad = (-N) % bt
    x2 = x.reshape(N * H, W)                       # free metadata reshape
    if n_pad:
        x2 = jnp.concatenate([x2, jnp.zeros((n_pad * H, W), x.dtype)], axis=0)
    n_tot = N + n_pad
    R = bt * H

    out = pl.pallas_call(
        _make_sobel_kernel(H),
        out_shape=jax.ShapeDtypeStruct((n_tot * H, W), x.dtype),
        grid=(n_tot // bt,),
        in_specs=[pl.BlockSpec((R, W), lambda i: (i, 0))],
        out_specs=pl.BlockSpec((R, W), lambda i: (i, 0)),
        compiler_params=pltpu.CompilerParams(
            dimension_semantics=("parallel",),
            vmem_limit_bytes=48 * 1024 * 1024,
        ),
    )(x2)

    if n_pad:
        out = out[: N * H]
    return out.reshape(N, 1, H, W)


# ------------------------- pure-JAX reference check ------------------------ #

def sobel_ref(x):
    kx = jnp.array([[-1., 0., 1.], [-2., 0., 2.], [-1., 0., 1.]], jnp.float32)
    ky = jnp.array([[-1., -2., -1.], [0., 0., 0.], [1., 2., 1.]], jnp.float32)
    w = jnp.stack([kx, ky], axis=-1)[:, :, None, :]          # (3,3,1,2) HWIO
    xn = jnp.transpose(x, (0, 2, 3, 1))                      # NHWC
    g = lax.conv_general_dilated(xn, w, (1, 1), ((1, 1), (1, 1)),
                                 dimension_numbers=("NHWC", "HWIO", "NHWC"))
    edge = jnp.sqrt(g[..., 0] ** 2 + g[..., 1] ** 2)         # (N, H, W)
    return edge[:, None, :, :]


# ----------------------------------- main ---------------------------------- #

if __name__ == "__main__":
    key = jax.random.PRNGKey(0)
    N, H, W = 2, 16, 16
    x = jax.random.normal(key, (N, 1, H, W), jnp.float32)

    out = jax.block_until_ready(jax.jit(sobel_edge_detection)(x))
    assert out.shape == (N, 1, H, W)

    ref = sobel_ref(x)
    if not jnp.allclose(out, ref, atol=1e-4, rtol=1e-4):
        raise SystemExit("mismatch vs reference: max abs err = %g"
                         % float(jnp.max(jnp.abs(out - ref))))
    print("KERNEL_OK")
</pallas_src>

<mosaic_0001>
module attributes {stable_mosaic.version = 11 : i64} {
  func.func @kernel(%arg0: i32, %arg1: memref<16x16xf32, #tpu.memory_space<vmem>>, %arg2: memref<16x16xf32, #tpu.memory_space<vmem>>) attributes {dimension_semantics = [#tpu.dimension_semantics<parallel>], iteration_bounds = array<i64: 2>, scalar_prefetch = 0 : i64, scratch_operands = 0 : i64, tpu.core_type = #tpu.core_type<tc>, window_params = [{transform_indices = @transform_0, window_bounds = array<i64: 16, 16>}, {transform_indices = @transform_1, window_bounds = array<i64: 16, 16>}]} {
    %c0 = arith.constant 0 : index
    %c0_0 = arith.constant 0 : index
    %0 = vector.load %arg1[%c0, %c0_0] : memref<16x16xf32, #tpu.memory_space<vmem>>, vector<16x16xf32>
    %1 = tpu.iota {dimensions = array<i32: 0>} : vector<16x16xi32>
    %c16_i32 = arith.constant 16 : i32
    %c0_i32 = arith.constant 0 : i32
    %2 = arith.cmpi eq, %c16_i32, %c0_i32 : i32
    %c1_i32 = arith.constant 1 : i32
    %3 = arith.select %2, %c1_i32, %c16_i32 : i32
    %4 = vector.broadcast %3 : i32 to vector<16x16xi32>
    %5 = arith.remsi %1, %4 : vector<16x16xi32>
    %c0_i32_1 = arith.constant 0 : i32
    %6 = vector.broadcast %c0_i32_1 : i32 to vector<16x16xi32>
    %7 = arith.cmpi ne, %5, %6 : vector<16x16xi32>
    %c0_i32_2 = arith.constant 0 : i32
    %8 = vector.broadcast %c0_i32_2 : i32 to vector<16x16xi32>
    %9 = arith.cmpi slt, %5, %8 : vector<16x16xi32>
    %c0_i32_3 = arith.constant 0 : i32
    %10 = arith.cmpi slt, %3, %c0_i32_3 : i32
    %11 = vector.broadcast %10 : i1 to vector<16x16xi1>
    %12 = vector.broadcast %11 : vector<16x16xi1> to vector<16x16xi1>
    %13 = arith.xori %9, %12 : vector<16x16xi1>
    %14 = arith.andi %13, %7 : vector<16x16xi1>
    %15 = vector.broadcast %3 : i32 to vector<16x16xi32>
    %16 = arith.addi %5, %15 : vector<16x16xi32>
    %17 = arith.select %14, %16, %5 : vector<16x16xi1>, vector<16x16xi32>
    %18 = tpu.iota {dimensions = array<i32: 1>} : vector<16x16xi32>
    %c0_i32_4 = arith.constant 0 : i32
    %19 = vector.broadcast %c0_i32_4 : i32 to vector<16x16xi32>
    %20 = arith.cmpi eq, %17, %19 : vector<16x16xi32>
    %c15_i32 = arith.constant 15 : i32
    %21 = vector.broadcast %c15_i32 : i32 to vector<16x16xi32>
    %22 = arith.cmpi eq, %17, %21 : vector<16x16xi32>
    %c0_i32_5 = arith.constant 0 : i32
    %23 = vector.broadcast %c0_i32_5 : i32 to vector<16x16xi32>
    %24 = arith.cmpi eq, %18, %23 : vector<16x16xi32>
    %c15_i32_6 = arith.constant 15 : i32
    %25 = vector.broadcast %c15_i32_6 : i32 to vector<16x16xi32>
    %26 = arith.cmpi eq, %18, %25 : vector<16x16xi32>
    %c1_i32_7 = arith.constant 1 : i32
    %27 = tpu.dynamic_rotate %0 by %c1_i32_7 dim 1 : vector<16x16xf32>, i32 -> vector<16x16xf32>
    %cst = arith.constant 0.000000e+00 : f32
    %28 = vector.broadcast %cst : f32 to vector<16x16xf32>
    %29 = arith.select %24, %28, %27 : vector<16x16xi1>, vector<16x16xf32>
    %c15_i32_8 = arith.constant 15 : i32
    %30 = tpu.dynamic_rotate %0 by %c15_i32_8 dim 1 : vector<16x16xf32>, i32 -> vector<16x16xf32>
    %cst_9 = arith.constant 0.000000e+00 : f32
    %31 = vector.broadcast %cst_9 : f32 to vector<16x16xf32>
    %32 = arith.select %26, %31, %30 : vector<16x16xi1>, vector<16x16xf32>
    %33 = arith.subf %32, %29 : vector<16x16xf32>
    %cst_10 = arith.constant 2.000000e+00 : f32
    %34 = vector.broadcast %cst_10 : f32 to vector<16x16xf32>
    %35 = arith.mulf %34, %0 : vector<16x16xf32>
    %36 = arith.addf %29, %35 : vector<16x16xf32>
    %37 = arith.addf %36, %32 : vector<16x16xf32>
    %c1_i32_11 = arith.constant 1 : i32
    %38 = tpu.dynamic_rotate %33 by %c1_i32_11 dim 0 : vector<16x16xf32>, i32 -> vector<16x16xf32>
    %cst_12 = arith.constant 0.000000e+00 : f32
    %39 = vector.broadcast %cst_12 : f32 to vector<16x16xf32>
    %40 = arith.select %20, %39, %38 : vector<16x16xi1>, vector<16x16xf32>
    %c15_i32_13 = arith.constant 15 : i32
    %41 = tpu.dynamic_rotate %33 by %c15_i32_13 dim 0 : vector<16x16xf32>, i32 -> vector<16x16xf32>
    %cst_14 = arith.constant 0.000000e+00 : f32
    %42 = vector.broadcast %cst_14 : f32 to vector<16x16xf32>
    %43 = arith.select %22, %42, %41 : vector<16x16xi1>, vector<16x16xf32>
    %c1_i32_15 = arith.constant 1 : i32
    %44 = tpu.dynamic_rotate %37 by %c1_i32_15 dim 0 : vector<16x16xf32>, i32 -> vector<16x16xf32>
    %cst_16 = arith.constant 0.000000e+00 : f32
    %45 = vector.broadcast %cst_16 : f32 to vector<16x16xf32>
    %46 = arith.select %20, %45, %44 : vector<16x16xi1>, vector<16x16xf32>
    %c15_i32_17 = arith.constant 15 : i32
    %47 = tpu.dynamic_rotate %37 by %c15_i32_17 dim 0 : vector<16x16xf32>, i32 -> vector<16x16xf32>
    %cst_18 = arith.constant 0.000000e+00 : f32
    %48 = vector.broadcast %cst_18 : f32 to vector<16x16xf32>
    %49 = arith.select %22, %48, %47 : vector<16x16xi1>, vector<16x16xf32>
    %cst_19 = arith.constant 2.000000e+00 : f32
    %50 = vector.broadcast %cst_19 : f32 to vector<16x16xf32>
    %51 = arith.mulf %50, %33 : vector<16x16xf32>
    %52 = arith.addf %40, %51 : vector<16x16xf32>
    %53 = arith.addf %52, %43 : vector<16x16xf32>
    %54 = arith.subf %49, %46 : vector<16x16xf32>
    %55 = arith.mulf %53, %53 : vector<16x16xf32>
    %56 = arith.mulf %54, %54 : vector<16x16xf32>
    %57 = arith.addf %55, %56 : vector<16x16xf32>
    %58 = math.sqrt %57 : vector<16x16xf32>
    %c0_20 = arith.constant 0 : index
    %c0_21 = arith.constant 0 : index
    %59 = vector.load %arg2[%c0_20, %c0_21] : memref<16x16xf32, #tpu.memory_space<vmem>>, vector<16x16xf32>
    tpu.vector_store %arg2[%c0_20, %c0_21], %58 {strides = array<i32>} : memref<16x16xf32, #tpu.memory_space<vmem>>, vector<16x16xf32>,
    return
  }
  func.func @transform_0(%arg0: i32) -> (i32, i32) {
    %c0_i32 = arith.constant 0 : i32
    %c0_i32_0 = arith.constant 0 : i32
    return %arg0, %c0_i32 : i32, i32
  }
  func.func @transform_1(%arg0: i32) -> (i32, i32) {
    %c0_i32 = arith.constant 0 : i32
    %c0_i32_0 = arith.constant 0 : i32
    return %arg0, %c0_i32 : i32, i32
  }
}

</mosaic_0001>

<bundles_post_ra>
// kernel: sobel_edge_detection.1
= control target key start
LH: loop header
LB: loop body
LE: loop exit
PB: predicated region body
PF: predicated region fallthrough
CT: control target
= control target key end

     0   :  { %6 = vsyncpa [#allocation3], 0  ;;  %s727_s0 = inlined_call_operand.hbm [shape: f32[32,16], index: 0, kind: input, shape index: {}]   ;;  %s728_s1 = inlined_call_operand.hbm [shape: f32[32,16], index: 1, kind: output, shape index: {}]  }
   0x1   :  { %8 = vsyncpa [#allocation3 + $0x1], 0 }
   0x2   :  { %9 = vsyncpa [#allocation4], 0 }
   0x3   :  { %11 = vsyncpa [#allocation4 + $0x1], 0  ;;  %s543_s6 = smov 0   ;;  %s545_s7 = smov 0  }
   0x4   :  { %s547_s8 = smov 0   ;;  %s549_s9 = smov 0  }
   0x5 LB: > { %s564_s10 = sadd.s32 4294967295, %s522_s9   ;;  %s357_s11 = sadd.s32 4294967294, %s522_s9   ;;  %s522_s9 = sphi %s549_s9, %s747_s9   ;;  %s518_s8 = sphi %s547_s8, %s746_s8   ;;  %s514_s7 = sphi %s545_s7, %s745_s7   ;;  %s510_s6 = sphi %s543_s6, %s744_s6  }
   0x6   : > { %s568_s12 = sadd.s32 1, %s522_s9   ;;  %s24_s13 = sadd.s32 1, %s518_s8 }
   0x7   : > { %s21_s14 = ssub.s32 %s522_s9, %s568_s12  ;;  %p31_p0 = scmp.ne.s32.totalorder %s518_s8, %s514_s7 }
   0x8   : > { %p22_p1 = scmp.eq.s32.totalorder %s21_s14, 0  ;;  %p32_p2 = scmp.eq.s32.totalorder %s522_s9, 0 }
   0x9   : > { %p37_p3 = scmp.ne.s32.totalorder %s514_s7, %s510_s6  ;;  %p38_p4 = scmp.eq.s32.totalorder %s564_s10, 0 }
   0xa   : > { %s580_s15 = scalar_select %p22_p1, %s518_s8, %s24_s13  }
   0xb   : > { %p582_p5 = por %p32_p2, %p31_p0  ;;  %p586_p6 = por %p38_p4, %p37_p3 }
   0xc   : > { %p61_p7 = scmp.eq.s32.totalorder %s564_s10, 1  ;;  %p67_p8 = scmp.eq.s32.totalorder %s357_s11, 1 }
   0xd   : > { %s732_s17 = scalar_select %p586_p6, 1, 0 }
   0xe   : > { %p385_p10 = scmp.lt.s32.totalorder %s522_s9, 2  ;;  %p593_p11 = por %p61_p7, %p31_p0 }
   0xf   : > { %p597_p12 = por %p67_p8, %p37_p3  ;;  %s87_s20 = sand.u32 1, %s518_s8  }
  0x10   : > { %s733_s18 = scalar_select %p593_p11, 1, 0 }
  0x11   : > { %s734_s19 = scalar_select %p597_p12, 1, 0 }
  0x12   : > { %s371_s21 = sshll.u32 %s522_s9, 8  ;;  %s360_s22 = sshll.u32 %s87_s20, 4 }
  0x13   : > { %s606_s25 = scalar_lea.hbm %s727_s0, %s371_s21  ;;  %s91_s26 = scalar_lea.vmem [#allocation2], %s360_s22 }
  0x14   : > { %s98_s27 = sshll.u32 %s91_s26, 4  ;;  %p610_p13 = pnand %p385_p10, %p582_p5  ;;  %s614_s27 = int_to_ptr.vmem [resolvable:$true] %s98_s27 }
  0x15   : > { %s616_s29 = scalar_lea.sflag [#allocation3], %s87_s20  ;;  %s430_s30 = scalar_lea.hbm %s606_s25, 256 }
  0x16   : > { %p431_p0 = scmp.ne.s32.totalorder %s606_s25, %s430_s30  ;;  %p432_p1 = pneg %p610_p13 }
  0x17   : > { %s435_s4 = scalar_lea.hbm %s727_s0, 512  ;;  %p436_p4 = scmp.lt.s32.totalorder %s606_s25, %s727_s0 }
  0x18   : > { %p433_p2 = pnand %p432_p1, %p431_p0  ;;  %p437_p5 = scmp.lt.s32.totalorder %s435_s4, %s430_s30 }
  0x1a   : > { %p434_p3 = pneg %p433_p2  ;;  %p438_p7 = por %p437_p5, %p436_p4 }
  0x1c   : > { %p439_p8 = pnand %p438_p7, %p434_p3 }
  0x1e   : > { %442 = shalt.err (!%p439_p8)
}
  0x1f   : > { %s443_s13 = scalar_lea.vmem %s614_s27, 256  ;;  %s524_s14 = smov [#allocation2]  }
  0x20   : > { %p444_p10 = scmp.ne.s32.totalorder %s614_s27, %s443_s13  ;;  %s448_s16 = sshll.u32 %s524_s14, 4  ;;  %s449_s16 = int_to_ptr.vmem [resolvable:$false] %s448_s16 }
  0x21   : > { %s450_s20 = scalar_lea.vmem %s449_s16, 512  ;;  %p451_p2 = scmp.lt.s32.totalorder %s614_s27, %s449_s16 }
  0x22   : > { %p446_p9 = pnand %p444_p10, %p432_p1  ;;  %p452_p12 = scmp.lt.s32.totalorder %s450_s20, %s443_s13 }
  0x24   : > { %p447_p0 = pneg %p446_p9  ;;  %p453_p11 = por %p452_p12, %p451_p2 }
  0x26   : > { %p454_p6 = pnand %p453_p11, %p447_p0 }
  0x28   : > { %457 = shalt.err (!%p454_p6)
}
  0x29   : > { %s525_s21 = smov 128   ;;  %s526_s22 = smov 8  }
  0x2a   : > { %380 = dma.hbm_to_vmem [thread:$0]  (!%p610_p13), %s606_s25, 256, %s614_s27, %s616_s29, %s525_s21, %s525_s21, %s526_s22  }
  0x2b   : > { %p363_p9 = scmp.ge.s32.totalorder %s522_s9, 1  ;;  %p106_p1 = scmp.lt.s32.totalorder %s522_s9, 3 }
  0x2d   : > { %p107_p3 = pnand %p363_p9, %p106_p1 }
  0x2e   : > { %s640_s23 = sand.u32 (!%p107_p3), 1, %s514_s7   ;;  %p736_p6 = scmp.ne.s32.totalorder (!%p107_p3), %s732_s17, 0 }
  0x2f   : > { %110 = sbr.rel (%p107_p3) target bundleno = 457 (0x1c9), region = 24  ;;  %s364_s24 = sshll.u32 (!%p107_p3), %s640_s23, 4 }
  0x30   : > { %s113_s26 = scalar_lea.sflag (!%p107_p3), [#allocation3], %s640_s23  ;;  %s116_s30 = scalar_lea.vmem (!%p107_p3), [#allocation2], %s364_s24 }
  0x34   : > { %501 = dma.done.wait (%p736_p6), %s113_s26, 256  }
  0x35   : > { %503 = vsyncadd (%p736_p6), %s113_s26, 4294967040  ;;  %v137_v0 = vld [vmem:[%s116_s30] sm:$0xff]  ;;  %s527_s25 = smov 16   ;;  %v138_v1 = vld [vmem:[%s116_s30 + $0x8] sm:$0xff]  ;;  %vm174_vm0 = vcmask 1047680   ;;  %s528_s27 = smov 113   ;;  %v139_v10 = vlaneseq }
  0x36   : > { %175 = vrot.lane.b32.xlu0 %v137_v0, %s527_s25  ;;  %s529_s17 = smov 127   ;;  %v207_v14 = vmul.f32 2.0, %v137_v0  ;;  %v208_v17 = vmul.f32 2.0, %v138_v1  ;;  %s372_s28 = sshll.u32 %s564_s10, 8  ;;  %vm267_vm8 = vcmask 130048  }
  0x37   : > { %v167_v11 = vand.u32 127, %v139_v10  ;;  %v140_v12 = vshrl.u32 %v139_v10, 7  ;;  %s134_s29 = scalar_lea.vmem [#allocation5], %s364_s24  ;;  %s682_s5 = scalar_lea.hbm %s728_s1, %s372_s28 }
  0x38   : > { %s284_s2 = sshll.u32 %s134_s29, 4  ;;  %s271_s10 = scalar_lea.sflag [#allocation4], %s640_s23  ;;  %s684_s2 = int_to_ptr.vmem [resolvable:$true] %s284_s2 }
  0x39   : > { %vm172_vm1 = vcmp.eq.s32.totalorder %v167_v11, 0  ;;  %vm173_vm2 = vcmp.eq.s32.totalorder %v167_v11, 15  ;;  %v141_v15 = vadd.s32 8, %v140_v12  ;;  %v146_v24 = vand.u32 15, %v140_v12  ;;  %s458_s11 = scalar_lea.vmem %s684_s2, 256  ;;  %p741_p12 = scmp.ne.s32.totalorder %s733_s18, 0 }
  0x3a   : > { %178 = vrot.lane.b32.xlu0 %v138_v1, %s527_s25  ;;  %vm215_vm3 = vcmp.lt.s32.totalorder %v140_v12, 1  ;;  %vm222_vm4 = vcmp.lt.s32.totalorder %v140_v12, 7  ;;  %p459_p11 = scmp.ne.s32.totalorder %s684_s2, %s458_s11  ;;  %s530_s13 = smov [#allocation5]  }
  0x3b   : > { %v153_v25 = vand.u32 15, %v141_v15  ;;  %vm652_vm5 = vcmp.eq.s32.totalorder %v146_v24, 0  ;;  %s462_s14 = sshll.u32 %s530_s13, 4  ;;  %s463_s14 = int_to_ptr.vmem [resolvable:$false] %s462_s14 }
  0x3c   : > { %p460_p13 = pnand %p459_p11, %p741_p12  ;;  %s464_s16 = scalar_lea.vmem %s463_s14, 512 }
  0x3d   : > { %vm656_vm6 = vcmp.eq.s32.totalorder %v153_v25, 15  ;;  %p465_p5 = scmp.lt.s32.totalorder %s684_s2, %s463_s14  ;;  %p466_p7 = scmp.lt.s32.totalorder %s464_s16, %s458_s11 }
  0x3e   : > { %p461_p4 = pneg %p460_p13 }
  0x3f   : > { %p467_p8 = por %p466_p7, %p465_p5 }
  0x41   : > { %p468_p10 = pnand %p467_p8, %p461_p4 }
  0xa8   : > { %v176_v2 = vpop.permute.xlu0 %175 }
  0xa9   : > { %v177_v3 = vsel %vm174_vm0, %v176_v2, %v137_v0 }
  0xaa   : > { %181 = vrot.lane.b32.xlu1 %v177_v3, %s527_s25 }
  0xac   : > { %v179_v4 = vpop.permute.xlu0 %178 }
  0xad   : > { %v180_v5 = vsel %vm174_vm0, %v179_v4, %v138_v1 }
  0xae   : > { %183 = vrot.lane.b32.xlu1 %v180_v5, %s527_s25 }
 0x11c   : > { %v182_v6 = vpop.permute.xlu1 %181 }
 0x11d   : > { %v185_v7 = vsel %vm174_vm0, %v182_v6, %v137_v0 }
 0x11e   : > { %189 = vrot.lane.b32.xlu0 %v185_v7, %s528_s27 }
 0x120   : > { %v184_v8 = vpop.permute.xlu1 %183 }
 0x121   : > { %v186_v9 = vsel %vm174_vm0, %v184_v8, %v138_v1 }
 0x122   : > { %197 = vrot.lane.b32.xlu0 %v185_v7, %s529_s17  ;;  %191 = vrot.lane.b32.xlu1 %v186_v9, %s528_s27 }
 0x126   : > { %199 = vrot.lane.b32.xlu1 %v186_v9, %s529_s17 }
 0x190   : > { %v190_v13 = vpop.permute.xlu0 %189 }
 0x191   : > { %v195_v16 = vsel %vm172_vm1, 0.0, %v190_v13 }
 0x192   : > { %v209_v22 = vadd.f32 %v207_v14, %v195_v16 }
 0x194   : > { %v192_v18 = vpop.permute.xlu1 %191  ;;  %v198_v19 = vpop.permute.xlu0 %197 }
 0x195   : > { %v196_v20 = vsel %vm172_vm1, 0.0, %v192_v18  ;;  %v203_v21 = vsel %vm173_vm2, 0.0, %v198_v19 }
 0x196   : > { %v205_v23 = vsub.f32 %v203_v21, %v195_v16  ;;  %v210_v26 = vadd.f32 %v208_v17, %v196_v20  ;;  %v211_v28 = vadd.f32 %v209_v22, %v203_v21 }
 0x198   : > { %v200_v27 = vpop.permute.xlu1 %199  ;;  %v213_v32 = vrot.slane %v205_v23, 7  ;;  %v220_v33 = vrot.slane %v205_v23, 1  ;;  %v227_v40 = vrot.slane %v211_v28, 7  ;;  %v233_v41 = vrot.slane %v211_v28, 1 }
 0x199   : > { %v204_v29 = vsel %vm173_vm2, 0.0, %v200_v27  ;;  %v239_v43 = vmul.f32 2.0, %v205_v23 }
 0x19a   : > { %v206_v30 = vsub.f32 %v204_v29, %v196_v20  ;;  %v212_v31 = vadd.f32 %v210_v26, %v204_v29 }
 0x19c   : > { %v214_v36 = vrot.slane %v206_v30, 7  ;;  %v221_v37 = vrot.slane %v206_v30, 1  ;;  %v228_v38 = vrot.slane %v212_v31, 7  ;;  %v234_v39 = vrot.slane %v212_v31, 1 }
 0x19d   : > { %v240_v42 = vmul.f32 2.0, %v206_v30 }
 0x19e   : > { %v216_v44 = vsel %vm215_vm3, %v213_v32, %v214_v36  ;;  %v217_v45 = vsel %vm215_vm3, %v214_v36, %v213_v32  ;;  %v224_v46 = vsel %vm222_vm4, %v221_v37, %v220_v33  ;;  %v229_v49 = vsel %vm215_vm3, %v227_v40, %v228_v38 }
 0x19f   : > { %v218_v47 = vsel %vm652_vm5, 0.0, %v217_v45  ;;  %v226_v48 = vsel %vm656_vm6, 0.0, %v224_v46  ;;  %v230_v50 = vsel %vm215_vm3, %v228_v38, %v227_v40  ;;  %v235_v52 = vsel %vm222_vm4, %v233_v41, %v234_v39 }
 0x1a0   : > { %v231_v51 = vsel %vm652_vm5, 0.0, %v230_v50  ;;  %v236_v53 = vsel %vm222_vm4, %v234_v39, %v233_v41  ;;  %v241_v54 = vadd.f32 %v239_v43, %v218_v47  ;;  %v223_v55 = vsel %vm222_vm4, %v220_v33, %v221_v37 }
 0x1a1   : > { %v238_v56 = vsel %vm656_vm6, 0.0, %v236_v53  ;;  %v242_v57 = vadd.f32 %v240_v42, %v216_v44  ;;  %v245_v58 = vsub.f32 %v235_v52, %v231_v51 }
 0x1a2   : > { %v243_v59 = vadd.f32 %v241_v54, %v223_v55  ;;  %v246_v60 = vsub.f32 %v238_v56, %v229_v49 }
 0x1a3   : > { %v244_v61 = vadd.f32 %v242_v57, %v226_v48  ;;  %v249_v63 = vmul.f32 %v245_v58, %v245_v58 }
 0x1a4   : > { %v247_v62 = vmul.f32 %v243_v59, %v243_v59  ;;  %v250_v0 = vmul.f32 %v246_v60, %v246_v60 }
 0x1a5   : > { %v248_v1 = vmul.f32 %v244_v61, %v244_v61 }
 0x1a6   : > { %v251_v2 = vadd.f32 %v249_v63, %v247_v62 }
 0x1a7   : > { %v252_v3 = vadd.f32 %v250_v0, %v248_v1 }
 0x1a8   : > { %426 = vrsqrt.f32 %v251_v2  ;;  %vm255_vm7 = vcmp.eq.f32.partialorder %v251_v2, inf  ;;  %v258_v7 = vand.u32 2147483648, %v251_v2  ;;  %vm257_vm9 = vcmp.eq.f32.partialorder %v251_v2, 0.0 }
 0x1a9   : > { %428 = vrsqrt.f32 %v252_v3  ;;  %vm262_vm10 = vcmp.eq.f32.partialorder %v252_v3, inf  ;;  %v265_v10 = vand.u32 2147483648, %v252_v3  ;;  %vm264_vm11 = vcmp.eq.f32.partialorder %v252_v3, 0.0 }
 0x1b5   : > { %v427_v4 = vpop.eup %426 }
 0x1b6   : > { %v429_v5 = vpop.eup %428  ;;  %v254_v6 = vmul.f32 %v427_v4, %v251_v2 }
 0x1b7   : > { %v261_v8 = vmul.f32 %v429_v5, %v252_v3 }
 0x1b8   : > { %v256_v9 = vsel %vm255_vm7, %v251_v2, %v254_v6 }
 0x1b9   : > { %v259_v11 = vsel %vm257_vm9, %v258_v7, %v256_v9  ;;  %v263_v12 = vsel %vm262_vm10, %v252_v3, %v261_v8 }
 0x1ba   : > { %v266_v13 = vsel %vm264_vm11, %v265_v10, %v263_v12  ;;  %268 = vst.msk [vmem:[%s134_s29] sm:$0xff] %vm267_vm8, %v259_v11 }
 0x1bb   : > { %269 = vst.msk [vmem:[%s134_s29 + $0x8] sm:$0xff] %vm267_vm8, %v266_v13 }
 0x1bc   : > { %471 = shalt.err (!%p468_p10)
}
 0x1bd   : > { %s472_s20 = scalar_lea.hbm %s682_s5, 256  ;;  %s476_s24 = scalar_lea.hbm %s728_s1, 512 }
 0x1be   : > { %p473_p0 = scmp.ne.s32.totalorder %s682_s5, %s472_s20  ;;  %p477_p1 = scmp.lt.s32.totalorder %s682_s5, %s728_s1 }
 0x1bf   : > { %p478_p3 = scmp.lt.s32.totalorder %s476_s24, %s472_s20 }
 0x1c0   : > { %p474_p2 = pnand %p473_p0, %p741_p12 }
 0x1c1   : > { %p479_p6 = por %p478_p3, %p477_p1 }
 0x1c2   : > { %p475_p9 = pneg %p474_p2 }
 0x1c4   : > { %p480_p11 = pnand %p479_p6, %p475_p9 }
 0x1c6   : > { %483 = shalt.err (!%p480_p11)
}
 0x1c7   : > { %s531_s25 = smov 128   ;;  %s532_s27 = smov 8  }
 0x1c8   : > { %375 = dma.vmem_to_hbm [thread:$0]  (%p741_p12), %s684_s2, 256, %s682_s5, %s271_s10, %s531_s25, %s531_s25, %s532_s27  }
 0x1c9 PF: > { %s299_s17 = sand.u32 1, %s510_s6   ;;  %p742_p13 = scmp.ne.s32.totalorder %s734_s19, 0 }
 0x1ca   : > { %p743_p4 = scmp.ge.s32.totalorder %s522_s9, 2  ;;  %s300_s28 = scalar_lea.sflag [#allocation4], %s299_s17 }
 0x1cc   : > { %p382_p5 = pnand %p743_p4, %p742_p13 }
 0x1ce   : > { %p383_p7 = pneg %p382_p5 }
 0x1d0   : > { %505 = dma.done.wait (%p383_p7), %s300_s28, 256  }
 0x1d1   : > { %507 = vsyncadd (%p383_p7), %s300_s28, 4294967040  ;;  %p14_p8 = scmp.ge.s32.totalorder %s568_s12, 4   ;;  %s744_s6 = smov %s514_s7 }
 0x1d2   : > { %s745_s7 = smov %s518_s8  ;;  %s746_s8 = smov %s580_s15 }
 0x1d3   : > { %s747_s9 = smov %s568_s12  ;;  %16 = sbr.rel (!%p14_p8) target bundleno = 5 (0x5), region = 69 }
 0x1d8   :  { %305 = vsyncpa [#allocation3], 1 }
 0x1d9   :  { %307 = vsyncpa [#allocation3 + $0x1], 1 }
 0x1da   :  { %308 = vsyncpa [#allocation4], 1 }
 0x1db   :  { %310 = vsyncpa [#allocation4 + $0x1], 1 }

</bundles_post_ra>
